<compile_context>
chip_gen: v7x
topology: tpu7x:2x2x1
jax: 0.10.0
libtpu: 0.0.40
codegen_flags: <defaults>
</compile_context>

<pallas_src>
import jax
import jax.numpy as jnp
import numpy as np
from jax.experimental import pallas as pl
from jax.experimental.pallas import tpu as pltpu

_LANES = 128
_TARGET_BLOCK_BYTES = 8 * 1024 * 1024     # ~8 MiB per block (mem-bound roofline)
_VMEM_LIMIT_BYTES = 48 * 1024 * 1024      # 2x(in+out) 8 MiB blocks ~= 32 MiB


def _drop_path_kernel(scale_ref, x_ref, o_ref):
    # scale_ref: (TILE_B, 1) float32, per-sample scale = mask / keep_prob
    # x_ref / o_ref: (TILE_B, TILE_F) in x.dtype
    o_ref[...] = (x_ref[...].astype(jnp.float32) * scale_ref[...]).astype(o_ref.dtype)


def _sublane_pack(itemsize):
    """Rows per fully packed vreg: 8 (4-byte), 16 (2-byte), 32 (1-byte dtypes)."""
    return max(8, 32 // max(1, int(itemsize)))


def _pick_tiles(B, F, itemsize):
    """Byte-budget-driven tile selection.

    Prefer whole-F blocks (single contiguous DMA per block, at most one masked
    lane-tail vreg per row) and a batch tile that is either the full batch or a
    multiple of the dtype sublane packing, grown toward ~8 MiB per block.  Very
    large F is split on 128-lane multiples instead.  Ragged edges are handled
    by the pl.cdiv grid (masked edge blocks), never by padding the array.
    """
    pack = _sublane_pack(itemsize)
    row_bytes = max(1, F * itemsize)
    tile_b_min = B if B <= pack else pack

    if tile_b_min * row_bytes <= _TARGET_BLOCK_BYTES:
        tile_f = F                                   # full feature dim per block
        if B <= pack:
            tile_b = B                               # full batch dim
        else:
            tile_b = (_TARGET_BLOCK_BYTES // row_bytes) // pack * pack
            tile_b = max(pack, min(tile_b, (B // pack) * pack))
    else:
        tile_b = tile_b_min
        budget_f = _TARGET_BLOCK_BYTES // max(1, tile_b * itemsize)
        tile_f = max(_LANES, (budget_f // _LANES) * _LANES)
        if F >= _LANES:
            tile_f = min(tile_f, (F // _LANES) * _LANES)
        else:
            tile_f = F
    return int(tile_b), int(tile_f)


def drop_path(x, drop_prob: float = 0.0, training: bool = False, key=None,
              donate_x: bool = False):
    """DropPath forward. x: (B, ...). Matches torch drop_path semantics."""
    if drop_prob == 0.0 or not training:
        return x
    if key is None:
        raise ValueError(
            "drop_path: a PRNG `key` is required when training with "
            "drop_prob > 0 (a fixed default key would drop the same samples "
            "every step and break stochastic-depth regularization).")

    keep_prob = 1.0 - float(drop_prob)
    orig_shape = x.shape
    B = orig_shape[0]
    F = int(np.prod(orig_shape[1:])) if x.ndim > 1 else 1

    # ---- per-sample mask & scale, hoisted out of the kernel hot path (f32) --
    u = jax.random.uniform(key, (B,), dtype=jnp.float32)
    mask = jnp.floor(jnp.float32(keep_prob) + u)           # 0.0 or 1.0
    scale = (mask / jnp.float32(keep_prob)).reshape(B, 1)  # stays float32

    xf = x.reshape(B, F)                                   # metadata-only reshape
    itemsize = jnp.dtype(x.dtype).itemsize
    tile_b, tile_f = _pick_tiles(B, F, itemsize)
    grid = (pl.cdiv(B, tile_b), pl.cdiv(F, tile_f))

    # TODO(synk): for large drop_prob, scalar-prefetch the mask and skip the
    # HBM read entirely for dropped sample blocks (write zeros directly).
    out = pl.pallas_call(
        _drop_path_kernel,
        out_shape=jax.ShapeDtypeStruct((B, F), x.dtype),
        grid=grid,
        in_specs=[
            pl.BlockSpec((tile_b, 1), lambda bi, fi: (bi, 0)),
            pl.BlockSpec((tile_b, tile_f), lambda bi, fi: (bi, fi)),
        ],
        out_specs=pl.BlockSpec((tile_b, tile_f), lambda bi, fi: (bi, fi)),
        compiler_params=pltpu.CompilerParams(
            dimension_semantics=("parallel", "parallel"),
            vmem_limit_bytes=_VMEM_LIMIT_BYTES,
        ),
        input_output_aliases=({1: 0} if donate_x else {}),
    )(scale, xf)

    return out.reshape(orig_shape)


class DropPath:
    """JAX/Pallas counterpart of the PyTorch DropPath module."""

    def __init__(self, drop_prob=None):
        self.drop_prob = drop_prob if drop_prob is not None else 0.0
        self.training = True

    def __call__(self, x, key=None):
        return drop_path(x, self.drop_prob, self.training, key=key)


if __name__ == "__main__":
    root = jax.random.PRNGKey(0)
    kx, k1, k2, k3, k4 = jax.random.split(root, 5)

    ok = True

    def ref_drop_path(x, drop_prob, key):
        """Pure-JAX reference using the same RNG stream as the wrapper."""
        keep_prob = 1.0 - drop_prob
        u = jax.random.uniform(key, (x.shape[0],), dtype=jnp.float32)
        mask = jnp.floor(jnp.float32(keep_prob) + u)
        scale = (mask / jnp.float32(keep_prob)).reshape(
            (x.shape[0],) + (1,) * (x.ndim - 1))
        return (x.astype(jnp.float32) * scale).astype(x.dtype)

    # ---- case 1: ViT-style (B, N, D) f32 ------------------------------------
    x1 = jax.random.normal(kx, (2, 8, 32), dtype=jnp.float32)
    y1 = jax.block_until_ready(drop_path(x1, 0.5, True, key=k1))
    ok &= bool(jnp.allclose(y1, ref_drop_path(x1, 0.5, k1), rtol=1e-6, atol=1e-6))
    # Each sample is either exactly zero or x / keep_prob.
    for b in range(x1.shape[0]):
        dropped = bool(jnp.all(y1[b] == 0.0))
        kept = bool(jnp.allclose(y1[b], x1[b] / 0.5, rtol=1e-6, atol=1e-6))
        ok &= (dropped or kept)

    # ---- case 2: feature size not a multiple of 128 (full-F block, no pad) ---
    x2 = jax.random.normal(kx, (2, 5, 7), dtype=jnp.float32)
    y2 = jax.block_until_ready(drop_path(x2, 0.3, True, key=k2))
    ok &= bool(jnp.allclose(y2, ref_drop_path(x2, 0.3, k2), rtol=1e-6, atol=1e-6))

    # ---- case 3: batch not a multiple of 8 (masked ragged batch edge) --------
    x3 = jax.random.normal(kx, (10, 3, 32), dtype=jnp.float32)
    y3 = jax.block_until_ready(drop_path(x3, 0.4, True, key=k3))
    ok &= bool(jnp.allclose(y3, ref_drop_path(x3, 0.4, k3), rtol=1e-6, atol=1e-6))

    # ---- case 4: bf16 activations (sublane-packing path, f32 scale) ----------
    x4 = jax.random.normal(kx, (16, 24, 16), dtype=jnp.bfloat16)
    y4 = jax.block_until_ready(drop_path(x4, 0.25, True, key=k4))
    ok &= bool(jnp.allclose(y4.astype(jnp.float32),
                            ref_drop_path(x4, 0.25, k4).astype(jnp.float32),
                            rtol=1e-6, atol=1e-6))

    # ---- case 5: eval path / drop_prob == 0 -> identity -----------------------
    module = DropPath(drop_prob=0.5)
    module.training = False
    ok &= bool(jnp.all(jax.block_until_ready(module(x1)) == x1))

    module2 = DropPath(drop_prob=0.0)
    module2.training = True
    ok &= bool(jnp.all(jax.block_until_ready(module2(x1)) == x1))

    print("KERNEL_OK" if ok else "KERNEL_MISMATCH")
</pallas_src>

<mosaic_0001>
module attributes {stable_mosaic.version = 11 : i64} {
  func.func @_drop_path_kernel(%arg0: i32, %arg1: i32, %arg2: memref<2x1xf32, #tpu.memory_space<vmem>>, %arg3: memref<2x256xf32, #tpu.memory_space<vmem>>, %arg4: memref<2x256xf32, #tpu.memory_space<vmem>>) attributes {dimension_semantics = [#tpu.dimension_semantics<parallel>, #tpu.dimension_semantics<parallel>], iteration_bounds = array<i64: 1, 1>, scalar_prefetch = 0 : i64, scratch_operands = 0 : i64, tpu.core_type = #tpu.core_type<tc>, window_params = [{transform_indices = @transform_0, window_bounds = array<i64: 2, 1>}, {transform_indices = @transform_1, window_bounds = array<i64: 2, 256>}, {transform_indices = @transform_2, window_bounds = array<i64: 2, 256>}]} {
    %c0 = arith.constant 0 : index
    %c0_0 = arith.constant 0 : index
    %0 = vector.load %arg3[%c0, %c0_0] : memref<2x256xf32, #tpu.memory_space<vmem>>, vector<2x256xf32>
    %c0_1 = arith.constant 0 : index
    %c0_2 = arith.constant 0 : index
    %1 = vector.load %arg2[%c0_1, %c0_2] : memref<2x1xf32, #tpu.memory_space<vmem>>, vector<2x1xf32>
    %2 = vector.broadcast %1 : vector<2x1xf32> to vector<2x256xf32>
    %3 = arith.mulf %0, %2 : vector<2x256xf32>
    %c0_3 = arith.constant 0 : index
    %c0_4 = arith.constant 0 : index
    %4 = vector.load %arg4[%c0_3, %c0_4] : memref<2x256xf32, #tpu.memory_space<vmem>>, vector<2x256xf32>
    tpu.vector_store %arg4[%c0_3, %c0_4], %3 {strides = array<i32>} : memref<2x256xf32, #tpu.memory_space<vmem>>, vector<2x256xf32>,
    return
  }
  func.func @transform_0(%arg0: i32, %arg1: i32) -> (i32, i32) {
    %c0_i32 = arith.constant 0 : i32
    %c0_i32_0 = arith.constant 0 : i32
    return %arg0, %c0_i32 : i32, i32
  }
  func.func @transform_1(%arg0: i32, %arg1: i32) -> (i32, i32) {
    %c0_i32 = arith.constant 0 : i32
    return %arg0, %arg1 : i32, i32
  }
  func.func @transform_2(%arg0: i32, %arg1: i32) -> (i32, i32) {
    %c0_i32 = arith.constant 0 : i32
    return %arg0, %arg1 : i32, i32
  }
}

</mosaic_0001>

<bundles_post_ra>
// kernel: tpu_custom_call.1
= control target key start
LH: loop header
LB: loop body
LE: loop exit
PB: predicated region body
PF: predicated region fallthrough
CT: control target
= control target key end

     0   :  { %v70_v1 = vmov 0   ;;  %s106_s0 = inlined_call_operand.vmem [shape: f32[2,1], index: 0, kind: input, shape index: {}]   ;;  %s107_s1 = inlined_call_operand.vmem [shape: f32[2,256], index: 1, kind: input, shape index: {}]   ;;  %s108_s2 = inlined_call_operand.hbm [shape: f32[2,256], index: 2, kind: output, shape index: {}]  }
   0x1   :  { %v13_v0 = vld [vmem:[%s106_s0] sm:$0x3]  ;;  %45 = vset.pattern.permute.xlu0 %v70_v1 }
   0x2   :  { %7 = vsyncpa [#allocation3], 0  ;;  %16 = vperm.xlu0 %45, %v13_v0   ;;  %v71_v2 = vmov 269488144   ;;  %v21_v4 = vlaneseq  ;;  %v12_v9 = vld [vmem:[%s107_s1] sm:$0xf] }
   0x3   :  { %v19_v3 = vunpack.c.l.s4 %v71_v2  ;;  %s72_s13 = smov [#allocation2]  }
   0x4   :  { %v22_v6 = vshrl.u32 %v21_v4, 7  ;;  %s34_s14 = sshll.u32 %s72_s13, 4  ;;  %s35_s14 = int_to_ptr.vmem [resolvable:$true] %s34_s14 }
   0x5   :  { %v20_v5 = vunpack.c.0.s8 %v19_v3  ;;  %s46_s0 = scalar_lea.vmem %s35_s14, 64  ;;  %p51_p1 = scmp.lt.s32.totalorder %s35_s14, %s35_s14 }
   0x6   :  { %p47_p0 = scmp.ne.s32.totalorder %s35_s14, %s46_s0  ;;  %p52_p2 = scmp.lt.s32.totalorder %s46_s0, %s46_s0 }
   0x7   :  { %v23_v7 = vsub.s32 %v20_v5, %v22_v6 }
   0x8   :  { %p53_p3 = por %p52_p2, %p51_p1 }
   0xa   :  { %p54_p4 = pnand %p53_p3, %p47_p0 }
  0x81   :  { %v17_v8 = vpop.permute.xlu0 %16 }
  0x82   :  { %v24_v10 = vrot.slane %v17_v8, %v23_v7 }
  0x84   :  { %v26_v11 = vmul.f32 %v24_v10, %v12_v9 }
  0x86   :  { %27 = vst [vmem:[#allocation2] sm:$0xf] %v26_v11 }
  0x87   :  { %57 = shalt.err (!%p54_p4)
}
  0x88   :  { %s58_s17 = scalar_lea.hbm %s108_s2, 64 }
  0x89   :  { %p59_p5 = scmp.ne.s32.totalorder %s108_s2, %s58_s17  ;;  %p62_p6 = scmp.lt.u32.totalorder %s58_s17, %s108_s2 }
  0x8b   :  { %p64_p7 = pnand %p62_p6, %p59_p5 }
  0x8d   :  { %67 = shalt.err (!%p64_p7)
}
  0x8e   :  { %37 = dma.vmem_to_hbm [thread:$0]  %s35_s14, 64, %s108_s2, [#allocation3]  }
  0x8f   :  { %68 = dma.done.wait [#allocation3], 64  }
  0x90   :  { %69 = vsyncadd [#allocation3], 4294967232 }
  0x91   :  { %41 = vsyncpa [#allocation3], 1 }

</bundles_post_ra>
